<compile_context>
chip_gen: v7x
topology: tpu7x:2x2x1
jax: 0.10.0
libtpu: 0.0.40
codegen_flags: <defaults>
</compile_context>

<pallas_src>
import functools
import math

import jax
import jax.numpy as jnp
from jax.experimental import pallas as pl
from jax.experimental.pallas import tpu as pltpu


# ---------------------------------------------------------------------------
# Pallas kernel: depthwise conv over lanes via K roll + masked FMA,
# bias fused into the store.
# ---------------------------------------------------------------------------
def _symlconv_kernel(x_ref, w_ref, o_ref, *, kernel_size, padding):
    # x_ref: (TR, T) rows = flattened (batch, channel); time T on lanes.
    # w_ref: (TR, K+1) f32 -- cols [0, K) are taps, col K is the fused bias.
    x = x_ref[...]
    tr, t = x.shape
    cdt = x.dtype                                     # compute dtype (bf16-native on v6e/v7x)

    w = w_ref[...]
    taps = w[:, :kernel_size].astype(cdt)             # (TR, K)
    bias = w[:, kernel_size:kernel_size + 1].astype(cdt)  # (TR, 1)

    # Lane (= time) index as a (1, T) vector; per-tap compares stay (1, T).
    lane = jax.lax.broadcasted_iota(jnp.int32, (1, t), 1)

    acc = None
    for k in range(kernel_size):                      # K tiny & static: unrolled
        s = k - padding                               # out[:, j] += w[:, k] * x[:, j + s]
        if s == 0:
            xs = x
        else:
            # xs[:, j] = x[:, (j + s) % T]  (XLU lane rotate), zero the wrap.
            xs = pltpu.roll(x, shift=(-s) % t, axis=1)
            keep = (lane < t - s) if s > 0 else (lane >= -s)   # (1, T) bool
            xs = jnp.where(keep, xs, 0)
        term = taps[:, k:k + 1] * xs
        acc = term if acc is None else acc + term

    o_ref[...] = (acc + bias).astype(o_ref.dtype)


# ---------------------------------------------------------------------------
# Weight preprocessing (glue): softmax over kernel dim + weight dropout.
# Deterministic given the PRNG key (matches F.dropout's inverted scaling).
# ---------------------------------------------------------------------------
def process_weight(weight, *, weight_softmax=True, weight_dropout=0.1,
                   training=True, dropout_key=None):
    c_half, _, k = weight.shape
    w = weight.reshape(c_half, k)
    if weight_softmax:
        w = jax.nn.softmax(w, axis=-1)
    if training and weight_dropout > 0.0:
        if dropout_key is None:
            raise ValueError("dropout_key required when training with dropout")
        # TODO(synk): bit-exact replication of torch's dropout RNG stream is
        # not possible; semantics (Bernoulli keep mask + 1/(1-p) scaling) match.
        keep = jax.random.bernoulli(dropout_key, 1.0 - weight_dropout, w.shape)
        w = jnp.where(keep, w / (1.0 - weight_dropout), jnp.zeros_like(w))
    return w


# ---------------------------------------------------------------------------
# Row-tile picker: ~2 MiB input blocks, rows a multiple of lcm(8, C) so the
# taps+bias block can be a constant resident block, and >= 2 grid steps
# (prefer >= 8 while each step still streams >= 512 KiB) for v7x megacore.
# ---------------------------------------------------------------------------
def _pick_row_tile(n_rows, n_channels, t, itemsize, *,
                   target_bytes=2 << 20, max_unit_bytes=8 << 20,
                   min_step_bytes=512 << 10):
    lcm8c = (8 * n_channels) // math.gcd(8, n_channels)
    # Row unit: multiple of 8 sublanes and (preferably) of C, so the weight
    # pattern repeats exactly per block.
    unit = lcm8c if lcm8c * t * itemsize <= max_unit_bytes else 8
    if n_rows < 2 * unit:
        return n_rows                                  # one full-array block
    row_bytes = t * itemsize
    tr = max(unit, (target_bytes // row_bytes) // unit * unit)
    # Megacore occupancy (v7x: 2 TCs): keep >= 2 grid steps, prefer >= 8 as
    # long as each step still streams >= min_step_bytes of input.
    cap = None
    for steps in (8, 4, 2):
        c_ = (n_rows // steps) // unit * unit
        if c_ >= unit and c_ * row_bytes >= min_step_bytes:
            cap = c_
            break
    if cap is None:
        cap = max(unit, (n_rows // 2) // unit * unit)
    return min(tr, cap)


# ---------------------------------------------------------------------------
# Wrapper: builds the per-channel (C, K+1) taps+bias pattern and calls the
# Pallas kernel on the flattened (R, T_pad) view.
# ---------------------------------------------------------------------------
def symmetric_lightweight_conv(x, weight, *, kernel_size=3, padding=1,
                               weight_softmax=True, weight_dropout=0.1,
                               training=True, dropout_key=None, bias=None):
    b, c, t = x.shape
    r = b * c
    itemsize = jnp.dtype(x.dtype).itemsize

    # --- weight preprocessing (tiny, plain JAX) ------------------------------
    w = process_weight(weight, weight_softmax=weight_softmax,
                       weight_dropout=weight_dropout, training=training,
                       dropout_key=dropout_key)                    # (C/2, K)
    # channel c < C/2 -> tap row c ; channel C/2+i -> tap row C/2-1-i.
    w_full = jnp.concatenate([w, w[::-1]], axis=0).astype(jnp.float32)  # (C, K)
    if bias is not None:
        bias_col = bias.reshape(c, 1).astype(jnp.float32)
    else:
        bias_col = jnp.zeros((c, 1), jnp.float32)
    w_chan = jnp.concatenate([w_full, bias_col], axis=-1)          # (C, K+1)

    # --- lane-dense time axis: zero-pad T up to a multiple of 128 ------------
    # (zero pad == conv1d's implicit right zero padding; extra cols sliced).
    t_pad = ((t + 127) // 128) * 128
    x2d = x.reshape(r, t)
    if t_pad != t:
        x2d = jnp.pad(x2d, ((0, 0), (0, t_pad - t)))

    # --- row tiling -----------------------------------------------------------
    tr = _pick_row_tile(r, c, t_pad, itemsize)
    resident = (tr % c == 0)
    if resident:
        # Constant taps+bias block (pattern repeats every C rows): DMA'd once.
        w_aug = jnp.tile(w_chan, (tr // c, 1))                     # (TR, K+1)
        w_spec = pl.BlockSpec((tr, kernel_size + 1), lambda i: (0, 0))
    else:
        # Fallback: B-replicated per-row taps streamed per block.
        w_aug = jnp.tile(w_chan, (b, 1))                           # (R, K+1)
        w_spec = pl.BlockSpec((tr, kernel_size + 1), lambda i: (i, 0))

    grid = (pl.cdiv(r, tr),)

    # --- explicit VMEM budget & cost hint ------------------------------------
    blk_bytes = tr * t_pad * itemsize                  # one in / out block
    w_blk_bytes = tr * 128 * 4                         # K+1 lanes pad to 128
    footprint = 4 * blk_bytes + 2 * w_blk_bytes        # double-buffered
    vmem_limit = int(min(max(footprint * 1.3 + (4 << 20), 16 << 20), 56 << 20))

    cost = pl.CostEstimate(
        flops=2 * kernel_size * r * t_pad,
        transcendentals=0,
        bytes_accessed=2 * r * t_pad * itemsize + int(w_aug.size) * 4)

    out2d = pl.pallas_call(
        functools.partial(_symlconv_kernel,
                          kernel_size=kernel_size, padding=padding),
        out_shape=jax.ShapeDtypeStruct((r, t_pad), x.dtype),
        grid=grid,
        in_specs=[pl.BlockSpec((tr, t_pad), lambda i: (i, 0)), w_spec],
        out_specs=pl.BlockSpec((tr, t_pad), lambda i: (i, 0)),
        compiler_params=pltpu.CompilerParams(
            dimension_semantics=("parallel",),
            vmem_limit_bytes=vmem_limit),
        cost_estimate=cost,
    )(x2d, w_aug)

    if t_pad != t:
        out2d = out2d[:, :t]
    return out2d.reshape(b, c, t)


# ---------------------------------------------------------------------------
# Literal (un-collapsed) reference in plain JAX, mirroring the PyTorch code.
# ---------------------------------------------------------------------------
def _flip_half(a):
    _, c, _ = a.shape
    return jnp.concatenate([a[:, : c // 2], a[:, c // 2:][:, ::-1]], axis=1)


def reference_forward(x, w_proc, padding=1):
    b, c, t = x.shape
    y = _flip_half(x).reshape(b * 2, c // 2, t)
    out = jax.lax.conv_general_dilated(
        y, w_proc[:, None, :], window_strides=(1,),
        padding=((padding, padding),),
        dimension_numbers=("NCH", "OIH", "NCH"),
        feature_group_count=c // 2)                                # depthwise
    out = out.reshape(b, c, t)
    return _flip_half(out)


if __name__ == "__main__":
    key = jax.random.PRNGKey(0)
    k_x, k_w, k_b, k_drop, k_x2, k_w2, k_b2 = jax.random.split(key, 7)

    # ---- Test 1: original config (d_size = C = 8, groups = d_size, K = 3,
    # padding = 1, n_heads = 1, weight_softmax = True), f32, R % TR == 0. ----
    B, C, T, K = 2, 8, 128, 3
    x = jax.random.normal(k_x, (B, C, T), dtype=jnp.float32)
    weight = 0.1 * jax.random.normal(k_w, (C // 2, 1, K), dtype=jnp.float32)
    bias_vec = jax.random.normal(k_b, (C,), dtype=jnp.float32)

    w_proc = process_weight(weight, weight_softmax=True, weight_dropout=0.1,
                            training=True, dropout_key=k_drop)
    ref = reference_forward(x, w_proc, padding=1)

    out = symmetric_lightweight_conv(
        x, weight, kernel_size=K, padding=1, weight_softmax=True,
        weight_dropout=0.1, training=True, dropout_key=k_drop, bias=None)
    out = jax.block_until_ready(out)
    assert out.shape == (B, C, T)
    assert jnp.allclose(out, ref, rtol=1e-5, atol=1e-5), "mismatch (f32, no bias)"

    out_b = symmetric_lightweight_conv(
        x, weight, kernel_size=K, padding=1, weight_softmax=True,
        weight_dropout=0.1, training=True, dropout_key=k_drop, bias=bias_vec)
    out_b = jax.block_until_ready(out_b)
    assert jnp.allclose(out_b, ref + bias_vec.reshape(1, C, 1),
                        rtol=1e-5, atol=1e-5), "mismatch (f32, bias)"

    # ---- Test 2: clipped tail block (R % TR != 0) and T not a multiple of
    # 128 (exercises the zero-pad + slice path), with fused bias. ----
    B2, C2, T2 = 5, 4, 96
    x2 = jax.random.normal(k_x2, (B2, C2, T2), dtype=jnp.float32)
    weight2 = 0.1 * jax.random.normal(k_w2, (C2 // 2, 1, K), dtype=jnp.float32)
    bias2 = jax.random.normal(k_b2, (C2,), dtype=jnp.float32)
    w_proc2 = process_weight(weight2, weight_softmax=True, weight_dropout=0.1,
                             training=True, dropout_key=k_drop)
    ref2 = reference_forward(x2, w_proc2, padding=1) + bias2.reshape(1, C2, 1)
    out2 = symmetric_lightweight_conv(
        x2, weight2, kernel_size=K, padding=1, weight_softmax=True,
        weight_dropout=0.1, training=True, dropout_key=k_drop, bias=bias2)
    out2 = jax.block_until_ready(out2)
    assert out2.shape == (B2, C2, T2)
    assert jnp.allclose(out2, ref2, rtol=1e-5, atol=1e-5), "mismatch (clipped/odd-T)"

    # ---- Test 3: bf16 input path (on-core compute stays in bf16). ----
    x_bf = x.astype(jnp.bfloat16)
    ref_bf = reference_forward(x_bf.astype(jnp.float32), w_proc, padding=1)
    out_bf = symmetric_lightweight_conv(
        x_bf, weight, kernel_size=K, padding=1, weight_softmax=True,
        weight_dropout=0.1, training=True, dropout_key=k_drop, bias=None)
    out_bf = jax.block_until_ready(out_bf)
    assert out_bf.dtype == jnp.bfloat16
    assert jnp.allclose(out_bf.astype(jnp.float32), ref_bf,
                        rtol=5e-2, atol=1e-1), "mismatch (bf16)"

    print("KERNEL_OK")
</pallas_src>

<mosaic_0001>
module attributes {stable_mosaic.version = 11 : i64} {
  func.func @_symlconv_kernel(%arg0: i32, %arg1: memref<8x128xf32, #tpu.memory_space<vmem>>, %arg2: memref<8x4xf32, #tpu.memory_space<vmem>>, %arg3: memref<8x128xf32, #tpu.memory_space<vmem>>) attributes {dimension_semantics = [#tpu.dimension_semantics<parallel>], iteration_bounds = array<i64: 2>, scalar_prefetch = 0 : i64, scratch_operands = 0 : i64, tpu.core_type = #tpu.core_type<tc>, window_params = [{transform_indices = @transform_0, window_bounds = array<i64: 8, 128>}, {pipeline_mode = #tpu.pipeline_mode<synchronous>, transform_indices = @transform_1, window_bounds = array<i64: 8, 4>}, {transform_indices = @transform_2, window_bounds = array<i64: 8, 128>}]} {
    %c0 = arith.constant 0 : index
    %c0_0 = arith.constant 0 : index
    %0 = vector.load %arg1[%c0, %c0_0] : memref<8x128xf32, #tpu.memory_space<vmem>>, vector<8x128xf32>
    %c0_1 = arith.constant 0 : index
    %c0_2 = arith.constant 0 : index
    %1 = vector.load %arg2[%c0_1, %c0_2] : memref<8x4xf32, #tpu.memory_space<vmem>>, vector<8x4xf32>
    %2 = vector.extract_strided_slice %1 {offsets = [0, 0], sizes = [8, 3], strides = [1, 1]} : vector<8x4xf32> to vector<8x3xf32>
    %3 = vector.extract_strided_slice %1 {offsets = [0, 3], sizes = [8, 1], strides = [1, 1]} : vector<8x4xf32> to vector<8x1xf32>
    %4 = tpu.iota {dimensions = array<i32: 1>} : vector<1x128xi32>
    %c1_i32 = arith.constant 1 : i32
    %5 = tpu.dynamic_rotate %0 by %c1_i32 dim 1 : vector<8x128xf32>, i32 -> vector<8x128xf32>
    %c1_i32_3 = arith.constant 1 : i32
    %6 = vector.broadcast %c1_i32_3 : i32 to vector<1x128xi32>
    %7 = arith.cmpi sge, %4, %6 : vector<1x128xi32>
    %c0_i32 = arith.constant 0 : i32
    %8 = arith.sitofp %c0_i32 : i32 to f32
    %9 = vector.shape_cast %7 : vector<1x128xi1> to vector<1x128xi1>
    %10 = vector.broadcast %9 : vector<1x128xi1> to vector<8x128xi1>
    %11 = vector.broadcast %8 : f32 to vector<8x128xf32>
    %12 = arith.select %10, %5, %11 : vector<8x128xi1>, vector<8x128xf32>
    %13 = vector.extract_strided_slice %2 {offsets = [0, 0], sizes = [8, 1], strides = [1, 1]} : vector<8x3xf32> to vector<8x1xf32>
    %14 = vector.broadcast %13 : vector<8x1xf32> to vector<8x128xf32>
    %15 = arith.mulf %14, %12 : vector<8x128xf32>
    %16 = vector.extract_strided_slice %2 {offsets = [0, 1], sizes = [8, 1], strides = [1, 1]} : vector<8x3xf32> to vector<8x1xf32>
    %17 = vector.broadcast %16 : vector<8x1xf32> to vector<8x128xf32>
    %18 = arith.mulf %17, %0 : vector<8x128xf32>
    %19 = arith.addf %15, %18 : vector<8x128xf32>
    %c127_i32 = arith.constant 127 : i32
    %20 = tpu.dynamic_rotate %0 by %c127_i32 dim 1 : vector<8x128xf32>, i32 -> vector<8x128xf32>
    %c127_i32_4 = arith.constant 127 : i32
    %21 = vector.broadcast %c127_i32_4 : i32 to vector<1x128xi32>
    %22 = arith.cmpi slt, %4, %21 : vector<1x128xi32>
    %c0_i32_5 = arith.constant 0 : i32
    %23 = arith.sitofp %c0_i32_5 : i32 to f32
    %24 = vector.shape_cast %22 : vector<1x128xi1> to vector<1x128xi1>
    %25 = vector.broadcast %24 : vector<1x128xi1> to vector<8x128xi1>
    %26 = vector.broadcast %23 : f32 to vector<8x128xf32>
    %27 = arith.select %25, %20, %26 : vector<8x128xi1>, vector<8x128xf32>
    %28 = vector.extract_strided_slice %2 {offsets = [0, 2], sizes = [8, 1], strides = [1, 1]} : vector<8x3xf32> to vector<8x1xf32>
    %29 = vector.broadcast %28 : vector<8x1xf32> to vector<8x128xf32>
    %30 = arith.mulf %29, %27 : vector<8x128xf32>
    %31 = arith.addf %19, %30 : vector<8x128xf32>
    %32 = vector.broadcast %3 : vector<8x1xf32> to vector<8x128xf32>
    %33 = arith.addf %31, %32 : vector<8x128xf32>
    %c0_6 = arith.constant 0 : index
    %c0_7 = arith.constant 0 : index
    %34 = vector.load %arg3[%c0_6, %c0_7] : memref<8x128xf32, #tpu.memory_space<vmem>>, vector<8x128xf32>
    tpu.vector_store %arg3[%c0_6, %c0_7], %33 {strides = array<i32>} : memref<8x128xf32, #tpu.memory_space<vmem>>, vector<8x128xf32>,
    return
  }
  func.func @transform_0(%arg0: i32) -> (i32, i32) {
    %c0_i32 = arith.constant 0 : i32
    %c0_i32_0 = arith.constant 0 : i32
    return %arg0, %c0_i32 : i32, i32
  }
  func.func @transform_1(%arg0: i32) -> (i32, i32) {
    %c0_i32 = arith.constant 0 : i32
    %c0_i32_0 = arith.constant 0 : i32
    %c0_i32_1 = arith.constant 0 : i32
    return %c0_i32, %c0_i32_0 : i32, i32
  }
  func.func @transform_2(%arg0: i32) -> (i32, i32) {
    %c0_i32 = arith.constant 0 : i32
    %c0_i32_0 = arith.constant 0 : i32
    return %arg0, %c0_i32 : i32, i32
  }
}

</mosaic_0001>

<bundles_post_ra>
// kernel: tpu_custom_call.1
= control target key start
LH: loop header
LB: loop body
LE: loop exit
PB: predicated region body
PF: predicated region fallthrough
CT: control target
= control target key end

     0   :  { %7 = vsyncpa [#allocation3], 0  ;;  %s641_s0 = inlined_call_operand.hbm [shape: f32[16,128], index: 0, kind: input, shape index: {}]   ;;  %s642_s1 = inlined_call_operand.vmem [shape: f32[8,4], index: 1, kind: input, shape index: {}]   ;;  %s643_s2 = inlined_call_operand.hbm [shape: f32[16,128], index: 2, kind: output, shape index: {}]  }
   0x1   :  { %9 = vsyncpa [#allocation3 + $0x1], 0 }
   0x2   :  { %10 = vsyncpa [#allocation4], 0 }
   0x3   :  { %12 = vsyncpa [#allocation4 + $0x1], 0  ;;  %s473_s9 = smov 0   ;;  %s475_s10 = smov 0  }
   0x4   :  { %s477_s11 = smov 0   ;;  %s479_s12 = smov 0  }
   0x5 LB: > { %s494_s13 = sadd.s32 4294967295, %s448_s12   ;;  %s283_s14 = sadd.s32 4294967294, %s448_s12   ;;  %s448_s12 = sphi %s479_s12, %s658_s12   ;;  %s444_s11 = sphi %s477_s11, %s657_s11   ;;  %s440_s10 = sphi %s475_s10, %s656_s10   ;;  %s436_s9 = sphi %s473_s9, %s655_s9  }
   0x6   : > { %s498_s15 = sadd.s32 1, %s448_s12   ;;  %s25_s16 = sadd.s32 1, %s444_s11 }
   0x7   : > { %s22_s17 = ssub.s32 %s448_s12, %s498_s15  ;;  %p32_p0 = scmp.ne.s32.totalorder %s444_s11, %s440_s10 }
   0x8   : > { %p23_p1 = scmp.eq.s32.totalorder %s22_s17, 0  ;;  %p33_p2 = scmp.eq.s32.totalorder %s448_s12, 0 }
   0x9   : > { %p38_p3 = scmp.ne.s32.totalorder %s440_s10, %s436_s9  ;;  %p39_p4 = scmp.eq.s32.totalorder %s494_s13, 0 }
   0xa   : > { %s510_s18 = scalar_select %p23_p1, %s444_s11, %s25_s16  }
   0xb   : > { %p512_p5 = por %p33_p2, %p32_p0  ;;  %p516_p6 = por %p39_p4, %p38_p3 }
   0xc   : > { %p83_p7 = scmp.eq.s32.totalorder %s494_s13, 1  ;;  %p89_p8 = scmp.eq.s32.totalorder %s283_s14, 1 }
   0xd   : > { %p307_p10 = scmp.lt.s32.totalorder %s448_s12, 2  ;;  %s112_s23 = sand.u32 1, %s444_s11  }
   0xe   : > { %p523_p11 = por %p83_p7, %p32_p0  ;;  %p527_p12 = por %p89_p8, %p38_p3 }
   0xf   : > { %s287_s24 = sshll.u32 %s448_s12, 7  ;;  %s286_s25 = sshll.u32 %s112_s23, 3 }
  0x10   : > { %s647_s21 = scalar_select %p523_p11, 1, 0 }
  0x11   : > { %s648_s22 = scalar_select %p527_p12, 1, 0 }
  0x12   : > { %s536_s28 = scalar_lea.hbm %s641_s0, %s287_s24  ;;  %s116_s29 = scalar_lea.vmem [#allocation2], %s286_s25 }
  0x13   : > { %s123_s30 = sshll.u32 %s116_s29, 4  ;;  %p540_p13 = pnand %p307_p10, %p512_p5  ;;  %s544_s30 = int_to_ptr.vmem [resolvable:$true] %s123_s30 }
  0x14   : > { %s113_s4 = scalar_lea.sflag [#allocation3], %s112_s23  ;;  %s352_s5 = scalar_lea.hbm %s536_s28, 128 }
  0x15   : > { %p353_p2 = scmp.ne.s32.totalorder %s536_s28, %s352_s5  ;;  %p354_p3 = pneg %p540_p13 }
  0x16   : > { %s357_s8 = scalar_lea.hbm %s641_s0, 256  ;;  %p358_p5 = scmp.lt.u32.totalorder %s536_s28, %s641_s0 }
  0x17   : > { %p355_p4 = pnand %p354_p3, %p353_p2  ;;  %p359_p8 = scmp.lt.u32.totalorder %s357_s8, %s352_s5 }
  0x18   : > { %p361_p9 = scmp.lt.u32.totalorder %s352_s5, %s536_s28 }
  0x19   : > { %p356_p7 = pneg %p355_p4  ;;  %p360_p10 = por %p359_p8, %p358_p5 }
  0x1b   : > { %p362_p0 = por %p361_p9, %p360_p10 }
  0x1d   : > { %p363_p1 = pnand %p362_p0, %p356_p7 }
  0x1f   : > { %366 = shalt.err (!%p363_p1)
}
  0x20   : > { %s367_s17 = scalar_lea.vmem %s544_s30, 128  ;;  %s450_s19 = smov [#allocation2]  }
  0x21   : > { %p368_p2 = scmp.ne.s32.totalorder %s544_s30, %s367_s17  ;;  %s372_s23 = sshll.u32 %s450_s19, 4  ;;  %s373_s23 = int_to_ptr.vmem [resolvable:$false] %s372_s23 }
  0x22   : > { %s374_s24 = scalar_lea.vmem %s373_s23, 256  ;;  %p375_p11 = scmp.lt.s32.totalorder %s544_s30, %s373_s23 }
  0x23   : > { %p370_p4 = pnand %p368_p2, %p354_p3  ;;  %p376_p5 = scmp.lt.s32.totalorder %s374_s24, %s367_s17 }
  0x25   : > { %p371_p12 = pneg %p370_p4  ;;  %p377_p8 = por %p376_p5, %p375_p11 }
  0x27   : > { %p378_p9 = pnand %p377_p8, %p371_p12 }
  0x29   : > { %381 = shalt.err (!%p378_p9)
}
  0x2a   : > { %302 = dma.hbm_to_vmem [thread:$0]  (!%p540_p13), %s536_s28, 128, %s544_s30, %s113_s4  }
  0x2b   : > { %p650_p0 = scmp.lt.s32.totalorder %s448_s12, 3  ;;  %p651_p1 = scmp.ge.s32.totalorder %s448_s12, 1 }
  0x2d   : > { %p129_p3 = pnand %p651_p1, %p650_p0 }
  0x2e   : > { %s578_s25 = sand.u32 (!%p129_p3), 1, %s440_s10  }
  0x2f   : > { %132 = sbr.rel (%p129_p3) target bundleno = 215 (0xd7), region = 28  ;;  %s289_s26 = sshll.u32 (!%p129_p3), %s578_s25, 3 }
  0x30   : > { %s135_s27 = scalar_lea.sflag (!%p129_p3), [#allocation3], %s578_s25  ;;  %s138_s29 = scalar_lea.vmem (!%p129_p3), [#allocation2], %s289_s26 }
  0x36   : > { %427 = dma.done.wait (%p516_p6), %s135_s27, 128  }
  0x37   : > { %429 = vsyncadd (%p516_p6), %s135_s27, 4294967168  ;;  %v451_v0 = vmov 2   ;;  %v452_v1 = vmov 0   ;;  %v160_v2 = vld [vmem:[%s642_s1] sm:$0xff]  ;;  %v453_v4 = vmov 1   ;;  %s454_s3 = smov 1   ;;  %v161_v6 = vlaneseq }
  0x38   : > { %349 = vset.pattern.permute.xlu1 %v451_v0  ;;  %347 = vset.pattern.permute.xlu0 %v452_v1  ;;  %v159_v3 = vld [vmem:[%s138_s29] sm:$0xff]  ;;  %v455_v5 = vmov 3   ;;  %s456_s20 = smov 127   ;;  %s292_s4 = sshll.u32 %s494_s13, 7 }
  0x39   : > { %188 = vperm.xlu1 %349, %v160_v2   ;;  %171 = vperm.xlu0 %347, %v160_v2   ;;  %v162_v7 = vand.u32 127, %v161_v6  ;;  %s158_s5 = scalar_lea.vmem [#allocation5], %s289_s26  ;;  %s597_s14 = scalar_lea.hbm %s643_s2, %s292_s4 }
  0x3a   : > { %s213_s6 = sshll.u32 %s158_s5, 4  ;;  %s200_s16 = scalar_lea.sflag [#allocation4], %s578_s25  ;;  %s599_s6 = int_to_ptr.vmem [resolvable:$true] %s213_s6 }
  0x3b   : > { %vm165_vm0 = vcmp.ge.s32.totalorder %v162_v7, 1  ;;  %vm183_vm1 = vcmp.lt.s32.totalorder %v162_v7, 127  ;;  %s382_s17 = scalar_lea.vmem %s599_s6, 128  ;;  %p652_p11 = scmp.ne.s32.totalorder %s647_s21, 0 }
  0x3c   : > { %p383_p6 = scmp.ne.s32.totalorder %s599_s6, %s382_s17  ;;  %s457_s13 = smov [#allocation5]  }
  0x3d   : > { %348 = vset.pattern.permute.xlu0 %v453_v4  ;;  %163 = vrot.lane.b32.xlu1 %v159_v3, %s454_s3  ;;  %s386_s19 = sshll.u32 %s457_s13, 4  ;;  %s387_s19 = int_to_ptr.vmem [resolvable:$false] %s386_s19 }
  0x3e   : > { %176 = vperm.xlu0 %348, %v160_v2   ;;  %350 = vset.pattern.permute.xlu1 %v455_v5  ;;  %p384_p12 = pnand %p383_p6, %p652_p11  ;;  %s388_s23 = scalar_lea.vmem %s387_s19, 256 }
  0x3f   : > { %p389_p7 = scmp.lt.s32.totalorder %s599_s6, %s387_s19  ;;  %p390_p10 = scmp.lt.s32.totalorder %s388_s23, %s382_s17 }
  0x40   : > { %p385_p13 = pneg %p384_p12 }
  0x41   : > { %194 = vperm.xlu1 %350, %v160_v2   ;;  %p391_p2 = por %p390_p10, %p389_p7 }
  0x42   : > { %181 = vrot.lane.b32.xlu0 %v159_v3, %s456_s20 }
  0x43   : > { %351 = vset.pattern.permute.xlu0 %v455_v5  ;;  %p392_p4 = pnand %p391_p2, %p385_p13 }
  0xb8   : > { %v189_v8 = vpop.permute.xlu1 %188  ;;  %v172_v9 = vpop.permute.xlu0 %171 }
  0xbc   : > { %v164_v10 = vpop.permute.xlu1 %163 }
  0xbd   : > { %v168_v11 = vsel %vm165_vm0, %v164_v10, 0.0  ;;  %v177_v12 = vpop.permute.xlu0 %176 }
  0xbe   : > { %v174_v13 = vmul.f32 %v172_v9, %v168_v11  ;;  %v179_v14 = vmul.f32 %v177_v12, %v159_v3 }
  0xc0   : > { %v180_v17 = vadd.f32 %v179_v14, %v174_v13  ;;  %v195_v19 = vpop.permute.xlu1 %194 }
  0xc1   : > { %v182_v15 = vpop.permute.xlu0 %181 }
  0xc2   : > { %v186_v16 = vsel %vm183_vm1, %v182_v15, 0.0 }
  0xc3   : > { %v191_v18 = vmul.f32 %v189_v8, %v186_v16 }
  0xc5   : > { %v192_v20 = vadd.f32 %v191_v18, %v180_v17 }
  0xc7   : > { %v197_v21 = vadd.f32 %v195_v19, %v192_v20 }
  0xc9   : > { %198 = vst [vmem:[%s158_s5] sm:$0xff] %v197_v21 }
  0xca   : > { %395 = shalt.err (!%p392_p4)
}
  0xcb   : > { %s396_s24 = scalar_lea.hbm %s597_s14, 128  ;;  %s400_s27 = scalar_lea.hbm %s643_s2, 256 }
  0xcc   : > { %p397_p5 = scmp.ne.s32.totalorder %s597_s14, %s396_s24  ;;  %p401_p0 = scmp.lt.u32.totalorder %s597_s14, %s643_s2 }
  0xcd   : > { %p402_p1 = scmp.lt.u32.totalorder %s400_s27, %s396_s24  ;;  %p404_p6 = scmp.lt.u32.totalorder %s396_s24, %s597_s14 }
  0xce   : > { %p398_p8 = pnand %p397_p5, %p652_p11 }
  0xcf   : > { %p403_p3 = por %p402_p1, %p401_p0 }
  0xd0   : > { %p399_p9 = pneg %p398_p8 }
  0xd1   : > { %p405_p12 = por %p404_p6, %p403_p3 }
  0xd3   : > { %p406_p13 = pnand %p405_p12, %p399_p9 }
  0xd5   : > { %409 = shalt.err (!%p406_p13)
}
  0xd6   : > { %297 = dma.vmem_to_hbm [thread:$0]  (%p652_p11), %s599_s6, 128, %s597_s14, %s200_s16  }
  0xd7 PF: > { %s225_s30 = sand.u32 1, %s436_s9   ;;  %p653_p7 = scmp.ne.s32.totalorder %s648_s22, 0 }
  0xd8   : > { %p654_p10 = scmp.ge.s32.totalorder %s448_s12, 2  ;;  %s226_s3 = scalar_lea.sflag [#allocation4], %s225_s30 }
  0xda   : > { %p304_p2 = pnand %p654_p10, %p653_p7 }
  0xdc   : > { %431 = dma.done.wait (!%p304_p2), %s226_s3, 128  }
  0xdd   : > { %433 = vsyncadd (!%p304_p2), %s226_s3, 4294967168  ;;  %p15_p4 = scmp.ge.s32.totalorder %s498_s15, 4   ;;  %s655_s9 = smov %s440_s10 }
  0xde   : > { %s656_s10 = smov %s444_s11  ;;  %s657_s11 = smov %s510_s18 }
  0xdf   : > { %s658_s12 = smov %s498_s15  ;;  %17 = sbr.rel (!%p15_p4) target bundleno = 5 (0x5), region = 73 }
  0xe6   :  { %231 = vsyncpa [#allocation3], 1 }
  0xe7   :  { %233 = vsyncpa [#allocation3 + $0x1], 1 }
  0xe8   :  { %234 = vsyncpa [#allocation4], 1 }
  0xe9   :  { %236 = vsyncpa [#allocation4 + $0x1], 1 }

</bundles_post_ra>
